<compile_context>
chip_gen: v5e
topology: v5e:2x2
jax: 0.10.0
libtpu: 0.0.40
codegen_flags: <defaults>
</compile_context>

<pallas_src>
import functools

import jax
import jax.numpy as jnp
from jax.experimental import pallas as pl
from jax.experimental.pallas import tpu as pltpu

_HIDDEN = 64  # first-layer width fixed by the module


def _round_up(v, m):
    return ((v + m - 1) // m) * m


def _cdiv(a, b):
    return (a + b - 1) // b


# ---------------------------------------------------------------------------
# Kernels
# ---------------------------------------------------------------------------

def _mlp_kernel_single(x_ref, w1_ref, b1_ref, w2_ref, b2_ref, o_ref):
    """Single-K fast path: whole W1 resident, no accumulator scratch."""
    h = jnp.dot(x_ref[...], w1_ref[...], preferred_element_type=jnp.float32)
    h = jnp.maximum(h + b1_ref[...], 0.0)                     # bias + ReLU (VPU)
    # Second layer (64 -> 1): VPU multiply + cross-lane reduce (XLU slack).
    out = jnp.sum(h * w2_ref[...], axis=-1, keepdims=True) + b2_ref[0, 0]
    o_ref[...] = out.astype(o_ref.dtype)


def _mlp_kernel_tiled(x_ref, w1_ref, b1_ref, w2_ref, b2_ref, o_ref, acc_ref,
                      *, snp, block_k, ragged_k):
    """K-tiled reduction with a persistent f32 accumulator in VMEM."""
    k = pl.program_id(1)

    @pl.when(k == 0)
    def _init():
        acc_ref[...] = jnp.zeros_like(acc_ref)

    x = x_ref[...]
    w1 = w1_ref[...]
    if ragged_k:
        # The last K block extends past snp and those VMEM entries are
        # unspecified (we deliberately do NOT jnp.pad x in the wrapper, which
        # would cost an extra full HBM pass).  Mask both operands to zero.
        # For non-last blocks the compare is all-true; the VPU work is hidden
        # under the DMA-bound pipeline.
        base = k * block_k
        col = jax.lax.broadcasted_iota(jnp.int32, x.shape, 1) + base
        x = jnp.where(col < snp, x, jnp.zeros_like(x))
        row = jax.lax.broadcasted_iota(jnp.int32, w1.shape, 0) + base
        w1 = jnp.where(row < snp, w1, jnp.zeros_like(w1))

    acc_ref[...] += jnp.dot(x, w1, preferred_element_type=jnp.float32)

    @pl.when(k == pl.num_programs(1) - 1)
    def _finalize():
        h = jnp.maximum(acc_ref[...] + b1_ref[...], 0.0)
        out = jnp.sum(h * w2_ref[...], axis=-1, keepdims=True) + b2_ref[0, 0]
        o_ref[...] = out.astype(o_ref.dtype)


# ---------------------------------------------------------------------------
# Tile / VMEM budgeting
# ---------------------------------------------------------------------------

def _vmem_capacity_bytes():
    try:
        info = pltpu.get_tpu_info()
        cap = getattr(info, "vmem_capacity_bytes", None)
        if cap:
            return int(cap)
    except Exception:
        pass
    return 64 * 1024 * 1024  # conservative fallback: v7x per-TensorCore VMEM


def _tile_footprint_bytes(bm, bk, itemsize, single_k):
    """Estimated VMEM bytes, accounting for (8, 128) lane padding."""
    bk_lanes = _round_up(bk, 128)
    bk_subl = _round_up(bk, 8)
    hid_lanes = _round_up(_HIDDEN, 128)
    fp = 2 * bm * bk_lanes * itemsize            # x tile, double-buffered
    fp += 2 * bk_subl * hid_lanes * itemsize     # W1 tile, double-buffered
    fp += 2 * _round_up(bm, 8) * 128 * 4         # (bm, 1) out tile, lane-padded
    fp += 4 * 8 * hid_lanes * 4                  # b1 / w2 rows
    if not single_k:
        fp += bm * hid_lanes * 4                 # f32 accumulator scratch
    return fp


def _pick_block_batch(B):
    if B < 8:
        return B                                   # full-extent batch block
    if B <= 16:
        target = _round_up(B, 8)
    else:
        # Large tiles amortize W1 re-reads, but keep >= 2 batch tiles so
        # v7x's two TensorCores both get work on the "parallel" axis.
        target = min(2048, _round_up(_cdiv(B, 2), 8))
    return min(target, (B // 8) * 8)


def _select_tiles(B, snp, itemsize, budget):
    bm = _pick_block_batch(B)
    # Prefer a single K step (whole W1 resident, no accumulator); otherwise
    # the largest multiple-of-128 K tile that fits the generation's budget.
    k_candidates = [snp] + [k for k in (8192, 4096, 2048, 1024, 512, 256, 128)
                            if k < snp]
    while True:
        for bk in k_candidates:
            if _tile_footprint_bytes(bm, bk, itemsize, bk == snp) <= budget:
                return bm, bk
        if bm <= 8:
            return bm, k_candidates[-1]
        bm = max(8, _round_up(bm // 2, 8))


# ---------------------------------------------------------------------------
# Wrapper
# ---------------------------------------------------------------------------

def simple_linear_forward(x, w1, b1, w2, b2, *, block_batch=None, block_k=None):
    """Pallas TPU implementation of SimpleLinear.forward.

    x:  (B, snp_number)   float32 or bfloat16
    w1: (snp_number, 64)  float32 or bfloat16 (transposed vs torch (64, snp))
    b1: (64,)   float32
    w2: (64, 1) float32   (transposed vs torch (1, 64))
    b2: (1,)    float32
    returns (B, 1) float32.

    Pass x / w1 already in bfloat16 to halve HBM traffic (the kernel keeps
    f32 accumulation); the wrapper never casts or pads x.
    """
    B, snp = x.shape
    assert w1.shape == (snp, _HIDDEN), "w1 must be (snp_number, 64)"
    hidden = _HIDDEN

    itemsize = max(jnp.dtype(x.dtype).itemsize, jnp.dtype(w1.dtype).itemsize)

    capacity = _vmem_capacity_bytes()
    budget = (capacity * 13) // 16  # ~104 MiB on v5e/v6e, ~52 MiB on v7x

    bm_auto, bk_auto = _select_tiles(B, snp, itemsize, budget)

    if block_batch is None:
        bm = bm_auto
    elif B < 8:
        bm = B
    else:
        bm = min(max(8, _round_up(int(block_batch), 8)), (B // 8) * 8)

    if block_k is None:
        bk = bk_auto
    else:
        bk = int(block_k)
        bk = snp if bk >= snp else max(128, _round_up(bk, 128))

    single_k = (bk == snp)
    est = _tile_footprint_bytes(bm, bk, itemsize, single_k)
    # Scoped-VMEM limit sized to the actual footprint (with headroom), never
    # exceeding physical capacity minus compiler scratch.
    vmem_limit = int(min(max(capacity - (8 << 20), 16 << 20),
                         max((est * 5) // 4 + (4 << 20), 32 << 20)))

    b1_row = jnp.asarray(b1, jnp.float32).reshape(1, hidden)
    w2_row = jnp.asarray(w2, jnp.float32).reshape(1, hidden)
    b2_sc = jnp.asarray(b2, jnp.float32).reshape(1, 1)

    grid_b = _cdiv(B, bm)
    out_shape = jax.ShapeDtypeStruct((B, 1), jnp.float32)

    if single_k:
        fn = pl.pallas_call(
            _mlp_kernel_single,
            out_shape=out_shape,
            grid_spec=pltpu.PrefetchScalarGridSpec(
                num_scalar_prefetch=0,
                grid=(grid_b,),
                in_specs=[
                    pl.BlockSpec((bm, snp), lambda i: (i, 0)),
                    pl.BlockSpec((snp, hidden), lambda i: (0, 0)),
                    pl.BlockSpec((1, hidden), lambda i: (0, 0)),
                    pl.BlockSpec((1, hidden), lambda i: (0, 0)),
                    pl.BlockSpec(memory_space=pltpu.MemorySpace.SMEM),  # b2
                ],
                out_specs=pl.BlockSpec((bm, 1), lambda i: (i, 0)),
            ),
            compiler_params=pltpu.CompilerParams(
                dimension_semantics=("parallel",),
                vmem_limit_bytes=vmem_limit,
            ),
        )
    else:
        grid_k = _cdiv(snp, bk)
        ragged_k = (snp % bk) != 0
        kernel = functools.partial(_mlp_kernel_tiled, snp=snp, block_k=bk,
                                   ragged_k=ragged_k)
        fn = pl.pallas_call(
            kernel,
            out_shape=out_shape,
            grid_spec=pltpu.PrefetchScalarGridSpec(
                num_scalar_prefetch=0,
                grid=(grid_b, grid_k),
                in_specs=[
                    pl.BlockSpec((bm, bk), lambda i, k: (i, k)),
                    pl.BlockSpec((bk, hidden), lambda i, k: (k, 0)),
                    pl.BlockSpec((1, hidden), lambda i, k: (0, 0)),
                    pl.BlockSpec((1, hidden), lambda i, k: (0, 0)),
                    pl.BlockSpec(memory_space=pltpu.MemorySpace.SMEM),  # b2
                ],
                out_specs=pl.BlockSpec((bm, 1), lambda i, k: (i, 0)),
                scratch_shapes=[pltpu.VMEM((bm, hidden), jnp.float32)],
            ),
            compiler_params=pltpu.CompilerParams(
                dimension_semantics=("parallel", "arbitrary"),
                vmem_limit_bytes=vmem_limit,
            ),
        )

    return fn(x, w1, b1_row, w2_row, b2_sc)


# ---------------------------------------------------------------------------
# Reference / tests
# ---------------------------------------------------------------------------

def _init_params(key, snp_number, hidden=_HIDDEN):
    """Deterministic init mimicking nn.Linear (uniform +/- 1/sqrt(fan_in))."""
    k1, k2, k3, k4 = jax.random.split(key, 4)
    bound1 = 1.0 / jnp.sqrt(snp_number)
    bound2 = 1.0 / jnp.sqrt(hidden)
    w1 = jax.random.uniform(k1, (snp_number, hidden), jnp.float32, -bound1, bound1)
    b1 = jax.random.uniform(k2, (hidden,), jnp.float32, -bound1, bound1)
    w2 = jax.random.uniform(k3, (hidden, 1), jnp.float32, -bound2, bound2)
    b2 = jax.random.uniform(k4, (1,), jnp.float32, -bound2, bound2)
    return w1, b1, w2, b2


def _reference(x, w1, b1, w2, b2):
    return jnp.maximum(x @ w1 + b1, 0.0) @ w2 + b2


if __name__ == "__main__":
    key = jax.random.PRNGKey(0)
    k1, k2, k3, k4, k5, k6 = jax.random.split(key, 6)

    # --- test 1: small, auto tiles (single-K fast path, one batch tile) ---
    B1, S1 = 8, 32
    x1 = jax.random.normal(k1, (B1, S1), jnp.float32)
    p1 = _init_params(k2, S1)
    out1 = jax.block_until_ready(simple_linear_forward(x1, *p1))
    ref1 = _reference(x1, *p1)
    assert out1.shape == (B1, 1)
    assert jnp.allclose(out1, ref1, atol=1e-5, rtol=1e-5), "test1 mismatch"

    # --- test 2: ragged batch + ragged K tiles, no wrapper padding copies ---
    B2, S2 = 10, 300
    x2 = jax.random.normal(k3, (B2, S2), jnp.float32)
    p2 = _init_params(k4, S2)
    out2 = jax.block_until_ready(
        simple_linear_forward(x2, *p2, block_batch=8, block_k=128))
    ref2 = _reference(x2, *p2)
    assert out2.shape == (B2, 1)
    assert jnp.allclose(out2, ref2, atol=1e-4, rtol=1e-4), "test2 mismatch"

    # --- test 3: multiple (partial) batch tiles + tiled K reduction ---
    B3, S3 = 20, 260
    x3 = jax.random.normal(k5, (B3, S3), jnp.float32)
    p3 = _init_params(k6, S3)
    out3 = jax.block_until_ready(
        simple_linear_forward(x3, *p3, block_batch=8, block_k=128))
    ref3 = _reference(x3, *p3)
    assert out3.shape == (B3, 1)
    assert jnp.allclose(out3, ref3, atol=1e-4, rtol=1e-4), "test3 mismatch"

    # --- test 4: bf16 inputs passed directly (no wrapper cast), f32 accum ---
    x4 = x1.astype(jnp.bfloat16)
    w1_4 = p1[0].astype(jnp.bfloat16)
    out4 = jax.block_until_ready(
        simple_linear_forward(x4, w1_4, p1[1], p1[2], p1[3]))
    assert out4.shape == (B1, 1)
    assert jnp.allclose(out4, ref1, atol=5e-2, rtol=5e-2), "test4 mismatch"

    print("KERNEL_OK")
</pallas_src>

<mosaic_0001>
module attributes {stable_mosaic.version = 11 : i64} {
  func.func @_mlp_kernel_single(%arg0: i32, %arg1: memref<8x32xf32, #tpu.memory_space<vmem>>, %arg2: memref<32x64xf32, #tpu.memory_space<vmem>>, %arg3: memref<1x64xf32, #tpu.memory_space<vmem>>, %arg4: memref<1x64xf32, #tpu.memory_space<vmem>>, %arg5: memref<1x1xf32, #tpu.memory_space<smem>>, %arg6: memref<8x1xf32, #tpu.memory_space<vmem>>) attributes {dimension_semantics = [#tpu.dimension_semantics<parallel>], iteration_bounds = array<i64: 1>, scalar_prefetch = 0 : i64, scratch_operands = 0 : i64, tpu.core_type = #tpu.core_type<tc>, window_params = [{transform_indices = @transform_0, window_bounds = array<i64: 8, 32>}, {pipeline_mode = #tpu.pipeline_mode<synchronous>, transform_indices = @transform_1, window_bounds = array<i64: 32, 64>}, {pipeline_mode = #tpu.pipeline_mode<synchronous>, transform_indices = @transform_2, window_bounds = array<i64: 1, 64>}, {pipeline_mode = #tpu.pipeline_mode<synchronous>, transform_indices = @transform_3, window_bounds = array<i64: 1, 64>}, {transform_indices = @transform_4, window_bounds = array<i64: 1, 1>}, {transform_indices = @transform_5, window_bounds = array<i64: 8, 1>}]} {
    %c0 = arith.constant 0 : index
    %c0_0 = arith.constant 0 : index
    %0 = vector.load %arg1[%c0, %c0_0] : memref<8x32xf32, #tpu.memory_space<vmem>>, vector<8x32xf32>
    %c0_1 = arith.constant 0 : index
    %c0_2 = arith.constant 0 : index
    %1 = vector.load %arg2[%c0_1, %c0_2] : memref<32x64xf32, #tpu.memory_space<vmem>>, vector<32x64xf32>
    %cst = arith.constant dense<0.000000e+00> : vector<8x64xf32>
    %2 = tpu.matmul %0, %1, %cst {dimension_numbers = #tpu.dot_dimension_numbers<[1], [0], [0], [1], [0, 0, 1, 1], [], []>} : vector<8x32xf32>, vector<32x64xf32>, vector<8x64xf32> -> vector<8x64xf32>
    %c0_3 = arith.constant 0 : index
    %c0_4 = arith.constant 0 : index
    %3 = vector.load %arg3[%c0_3, %c0_4] : memref<1x64xf32, #tpu.memory_space<vmem>>, vector<1x64xf32>
    %4 = vector.broadcast %3 : vector<1x64xf32> to vector<8x64xf32>
    %5 = arith.addf %2, %4 : vector<8x64xf32>
    %cst_5 = arith.constant 0.000000e+00 : f32
    %6 = vector.broadcast %cst_5 : f32 to vector<8x64xf32>
    %7 = arith.maximumf %5, %6 : vector<8x64xf32>
    %c0_6 = arith.constant 0 : index
    %c0_7 = arith.constant 0 : index
    %8 = vector.load %arg4[%c0_6, %c0_7] : memref<1x64xf32, #tpu.memory_space<vmem>>, vector<1x64xf32>
    %9 = vector.broadcast %8 : vector<1x64xf32> to vector<8x64xf32>
    %10 = arith.mulf %7, %9 : vector<8x64xf32>
    %cst_8 = arith.constant dense<0.000000e+00> : vector<8xf32>
    %11 = vector.multi_reduction <add>, %10, %cst_8 [1] : vector<8x64xf32> to vector<8xf32>
    %12 = vector.shape_cast %11 : vector<8xf32> to vector<8x1xf32>
    %c0_9 = arith.constant 0 : index
    %c0_10 = arith.constant 0 : index
    %13 = memref.load %arg5[%c0_9, %c0_10] : memref<1x1xf32, #tpu.memory_space<smem>>
    %14 = vector.broadcast %13 : f32 to vector<8x1xf32>
    %15 = arith.addf %12, %14 : vector<8x1xf32>
    %c0_11 = arith.constant 0 : index
    %c0_12 = arith.constant 0 : index
    %16 = vector.load %arg6[%c0_11, %c0_12] : memref<8x1xf32, #tpu.memory_space<vmem>>, vector<8x1xf32>
    tpu.vector_store %arg6[%c0_11, %c0_12], %15 {strides = array<i32>} : memref<8x1xf32, #tpu.memory_space<vmem>>, vector<8x1xf32>,
    return
  }
  func.func @transform_0(%arg0: i32) -> (i32, i32) {
    %c0_i32 = arith.constant 0 : i32
    %c0_i32_0 = arith.constant 0 : i32
    return %arg0, %c0_i32 : i32, i32
  }
  func.func @transform_1(%arg0: i32) -> (i32, i32) {
    %c0_i32 = arith.constant 0 : i32
    %c0_i32_0 = arith.constant 0 : i32
    %c0_i32_1 = arith.constant 0 : i32
    return %c0_i32, %c0_i32_0 : i32, i32
  }
  func.func @transform_2(%arg0: i32) -> (i32, i32) {
    %c0_i32 = arith.constant 0 : i32
    %c0_i32_0 = arith.constant 0 : i32
    %c0_i32_1 = arith.constant 0 : i32
    return %c0_i32, %c0_i32_0 : i32, i32
  }
  func.func @transform_3(%arg0: i32) -> (i32, i32) {
    %c0_i32 = arith.constant 0 : i32
    %c0_i32_0 = arith.constant 0 : i32
    %c0_i32_1 = arith.constant 0 : i32
    return %c0_i32, %c0_i32_0 : i32, i32
  }
  func.func @transform_4(%arg0: i32) -> (i32, i32) {
    %c0_i32 = arith.constant 0 : i32
    %c0_i32_0 = arith.constant 0 : i32
    %c0_i32_1 = arith.constant 0 : i32
    return %c0_i32, %c0_i32_0 : i32, i32
  }
  func.func @transform_5(%arg0: i32) -> (i32, i32) {
    %c0_i32 = arith.constant 0 : i32
    %c0_i32_0 = arith.constant 0 : i32
    return %arg0, %c0_i32 : i32, i32
  }
}

</mosaic_0001>

<bundles_post_ra>
// kernel: tpu_custom_call.1
= control target key start
LH: loop header
LB: loop body
LE: loop exit
PB: predicated region body
PF: predicated region fallthrough
CT: control target
= control target key end

     0   :  { %11 = vsyncpa [#allocation4], 0  ;;  %s216_s0 = inlined_call_operand.hbm [shape: f32[8,32], index: 0, kind: input, shape index: {}]   ;;  %s217_s1 = inlined_call_operand.hbm [shape: f32[32,64], index: 1, kind: input, shape index: {}]   ;;  %s218_s2 = inlined_call_operand.vmem [shape: f32[1,64], index: 2, kind: input, shape index: {}]   ;;  %s219_s3 = inlined_call_operand.vmem [shape: f32[1,64], index: 3, kind: input, shape index: {}]   ;;  %s220_s4 = inlined_call_operand.<no memory space> [shape: f32[1,1], index: 4, kind: input, shape index: {}]   ;;  %s221_s5 = inlined_call_operand.vmem [shape: f32[8,1], index: 5, kind: output, shape index: {}]  }
   0x1   :  { %s18_s20 = sshll.u32 %s216_s0, 4  ;;  %s19_s20 = int_to_ptr.hbm [resolvable:$true] %s18_s20 }
   0x2   :  { %12 = vsyncpa [#allocation6], 0  ;;  %s164_s21 = smov [#allocation3]   ;;  %s28_s25 = sshll.u32 %s217_s1, 4  ;;  %s29_s25 = int_to_ptr.hbm [resolvable:$true] %s28_s25 }
   0x3   :  { %s20_s22 = sshll.u32 %s164_s21, 4  ;;  %s165_s26 = smov [#allocation5]   ;;  %s21_s22 = int_to_ptr.vmem [resolvable:$true] %s20_s22 }
   0x4   :  { %23 = dma.hbm_to_vmem [thread:$0]  %s19_s20, 128, %s21_s22, [#allocation4]  }
   0x5   :  { %s30_s27 = sshll.u32 %s165_s26, 4  ;;  %s166_s28 = smov 128   ;;  %s31_s27 = int_to_ptr.vmem [resolvable:$true] %s30_s27 }
   0x6   :  { %s167_s29 = smov 8  }
   0x7   :  { %36 = dma.hbm_to_vmem [thread:$0]  %s29_s25, 512, %s31_s27, [#allocation6], %s166_s28, %s166_s28, %s167_s29  }
   0x8   :  { %160 = dma.done.wait [#allocation4], 128  }
   0x9   :  { %161 = vsyncadd [#allocation4], 4294967168 }
   0xa   :  { %162 = dma.done.wait [#allocation6], 512  }
   0xb   :  { %163 = vsyncadd [#allocation6], 4294966784  ;;  %v55_v0 = vld [vmem:[#allocation5 + $0x18] sm:$0xff]  ;;  %v54_v1 = vld [vmem:[#allocation5 + $0x10] sm:$0xff]  ;;  %vm60_vm0 = vcmask 261120   ;;  %vm90_vm1 = vcmask 523264   ;;  %v95_v12 = vstv %s220_s4 }
   0xc   :  { %76 = vmatpush.msra.mxu0 %v55_v0  ;;  %v53_v2 = vld [vmem:[#allocation5 + $0x8] sm:$0xff]  ;;  %v52_v3 = vld [vmem:[#allocation5] sm:$0xff]  ;;  %v51_v4 = vld [vmem:[#allocation3] sm:$0xff]  ;;  %vm97_vm2 = vcmask 7168  }
   0xd   :  { %v110_v5 = vld [vmem:[%s218_s2] ss:$0 sm:$0xff] }
   0xe   :  { %77 = vmatpush.msra.mxu0 %v54_v1  ;;  %v111_v8 = vld [vmem:[%s219_s3] ss:$0 sm:$0xff] }
  0x10   :  { %78 = vmatpush.msra.mxu0 %v53_v2 }
  0x12   :  { %79 = vmatpush.msra.mxu0 %v52_v3 }
  0x13   :  { %105 = vmatmul.msk.f32.vlgmr.msra.gmra.mxu0 %vm60_vm0, %v51_v4 }
  0x90   :  { %v81_v6 = vpop.f32.mrf.mxu0 }
  0x91   :  { %v82_v7 = vadd.f32 %v110_v5, %v81_v6 }
  0x93   :  { %v84_v9 = vmax.f32 %v82_v7, 0.0 }
  0x95   :  { %v89_v10 = vmul.f32 %v111_v8, %v84_v9 }
  0x97   :  { %v91_v11 = vsel %vm90_vm1, %v89_v10, 0.0 }
  0x98   :  { %92 = vadd.xlane.f32.xlu0 %v91_v11 }
 0x10b   :  { %v93_v13 = vpop.xlane.xlu0 %92 }
 0x10c   :  { %v96_v14 = vadd.f32 %v95_v12, %v93_v13 }
 0x10e   :  { %98 = vst.msk [vmem:[%s221_s5] sm:$0xff] %vm97_vm2, %v96_v14 }
 0x10f   :  { %103 = vsyncpa [#allocation4], 1 }
 0x110   :  { %104 = vsyncpa [#allocation6], 1 }

</bundles_post_ra>
